<compile_context>
chip_gen: v7x
topology: tpu7x:2x2x1
jax: 0.10.0
libtpu: 0.0.40
codegen_flags: <defaults>
</compile_context>

<pallas_src>
import jax
import jax.numpy as jnp
from jax.experimental import pallas as pl
from jax.experimental.pallas import tpu as pltpu

NEG_SLOPE = 0.2   # GATConv default negative_slope
LANES = 128       # lane width; feature dim is padded to this


def gat_fused_kernel(x_ref, w1_ref, b1_ref, w2_ref, b2_ref, adj_ref,
                     xbar_ref, z_ref):
    adj = adj_ref[...].astype(jnp.float32)        # [N, N] 0/1 mask (target, source)
    neg_mask = (adj - 1.0) * 1e30                 # 0 on edges, -1e30 off edges

    dp = b1_ref.shape[-1]                         # padded feature width (static)

    def layer(x_b, w_aug_ref, b_ref):
        # Single MXU pass: W_aug = [ W | v_src | v_dst | 0... ],
        # so columns [0, dp) give h, column dp gives a_src, dp+1 gives a_dst.
        hc = jnp.dot(x_b, w_aug_ref[...], preferred_element_type=jnp.float32)
        h_b = hc[:, :dp].astype(jnp.bfloat16)                      # [N, Dp]
        a_src = hc[:, dp:dp + 1]                                   # [N, 1]
        a_dst = hc[:, dp + 1:dp + 2]                               # [N, 1]

        # e[i, j] = a_dst[i] + a_src[j]  (target i aggregates from source j)
        e = a_dst + a_src.T                                        # [N, N]
        e = jnp.where(e > 0, e, NEG_SLOPE * e)                     # LeakyReLU(0.2)

        # Masked softmax: max over valid entries, mask folded into the exp.
        m = jnp.max(e + neg_mask, axis=-1, keepdims=True)          # [N, 1]
        p = adj * jnp.exp(e - m)                                   # [N, N]
        inv = pl.reciprocal(jnp.sum(p, axis=-1, keepdims=True), approx=True)
        alpha = (p * inv).astype(jnp.bfloat16)

        out = jnp.dot(alpha, h_b, preferred_element_type=jnp.float32) + b_ref[...]
        # ELU (min keeps the discarded exp branch finite; expm1 avoided for
        # Mosaic-lowering safety).
        return jnp.where(out > 0.0, out, jnp.exp(jnp.minimum(out, 0.0)) - 1.0)

    z = layer(x_ref[...], w1_ref, b1_ref)                          # = elu(gat1(x))
    z_ref[...] = z
    xbar_ref[...] = layer(z.astype(jnp.bfloat16), w2_ref, b2_ref)  # = elu(gat2(z))


def _prep_layer(layer_params, d, dp):
    """Build the augmented, lane-padded weight [Dp, Dp+LANES] and padded bias."""
    w = layer_params["w"]                               # [d, d]
    v_src = w @ layer_params["att_src"][0]              # [d] = W @ att_src^T
    v_dst = w @ layer_params["att_dst"][0]              # [d] = W @ att_dst^T
    w_aug = jnp.zeros((dp, dp + LANES), jnp.float32)
    w_aug = w_aug.at[:d, :d].set(w)
    w_aug = w_aug.at[:d, dp].set(v_src)
    w_aug = w_aug.at[:d, dp + 1].set(v_dst)
    bias = jnp.zeros((1, dp), jnp.float32).at[:, :d].set(layer_params["bias"])
    return w_aug.astype(jnp.bfloat16), bias


def gat_pyg_forward(params, x, adj):
    """eval-mode forward of GAT_pyg: returns (xbar, z)."""
    N, D = x.shape
    Dp = max(LANES, ((D + LANES - 1) // LANES) * LANES)

    w1, b1 = _prep_layer(params["gat1"], D, Dp)
    w2, b2 = _prep_layer(params["gat2"], D, Dp)
    x_p = jnp.pad(x, ((0, 0), (0, Dp - D))).astype(jnp.bfloat16)
    adj_b = adj.astype(jnp.bfloat16)   # 0/1 mask, half the DMA bytes of f32

    vmem = pl.BlockSpec(memory_space=pltpu.MemorySpace.VMEM)

    flops = 2 * (2 * N * Dp * (Dp + LANES) + 2 * N * N * Dp)
    transcendentals = 2 * (N * N + N * Dp + N)
    bytes_accessed = (N * Dp * 2                               # x (bf16)
                      + 2 * (Dp * (Dp + LANES) * 2 + Dp * 4)   # weights + bias
                      + N * N * 2                              # adj (bf16)
                      + 2 * N * Dp * 4)                        # two f32 outputs

    xbar_p, z_p = pl.pallas_call(
        gat_fused_kernel,
        out_shape=(jax.ShapeDtypeStruct((N, Dp), jnp.float32),
                   jax.ShapeDtypeStruct((N, Dp), jnp.float32)),
        in_specs=[vmem] * 6,
        out_specs=(vmem, vmem),
        cost_estimate=pl.CostEstimate(flops=flops,
                                      transcendentals=transcendentals,
                                      bytes_accessed=bytes_accessed),
    )(x_p, w1, b1, w2, b2, adj_b)

    return xbar_p[:, :D], z_p[:, :D]


def glorot(key, shape):
    fan_in, fan_out = shape[0], shape[-1]
    lim = (6.0 / (fan_in + fan_out)) ** 0.5
    return jax.random.uniform(key, shape, jnp.float32, -lim, lim)


def init_params(key, latent_dim):
    params = {}
    for i, name in enumerate(("gat1", "gat2")):
        kk = jax.random.split(jax.random.fold_in(key, i), 3)
        params[name] = dict(
            w=glorot(kk[0], (latent_dim, latent_dim)),       # lin weight (x @ W)
            att_src=glorot(kk[1], (1, latent_dim)),          # att_src (heads=1)
            att_dst=glorot(kk[2], (1, latent_dim)),          # att_dst (heads=1)
            bias=jnp.zeros((1, latent_dim), jnp.float32),    # bias
        )
    return params


if __name__ == "__main__":
    key = jax.random.PRNGKey(0)
    N, D, E = 16, 32, 40  # nodes, latent_dim, edges

    k_x, k_src, k_dst, k_params = jax.random.split(key, 4)
    x = jax.random.normal(k_x, (N, D), jnp.float32)
    src = jax.random.randint(k_src, (E,), 0, N)
    dst = jax.random.randint(k_dst, (E,), 0, N)
    edge_index = jnp.stack([src, dst])  # [2, E], PyG convention (row0=src, row1=dst)

    # Dense adjacency adj[target, source], with self loops (GATConv default).
    # Note: dense adjacency deduplicates repeated edges (PyG would count them twice).
    adj = jnp.zeros((N, N), jnp.float32).at[edge_index[1], edge_index[0]].set(1.0)
    adj = jnp.maximum(adj, jnp.eye(N, dtype=jnp.float32))

    params = init_params(k_params, D)

    fwd = jax.jit(lambda x_, adj_: gat_pyg_forward(params, x_, adj_))
    xbar, z = fwd(x, adj)
    jax.block_until_ready((xbar, z))

    assert xbar.shape == (N, D) and z.shape == (N, D)
    assert bool(jnp.all(jnp.isfinite(xbar))) and bool(jnp.all(jnp.isfinite(z)))
    print("KERNEL_OK")
</pallas_src>

<mosaic_0001>
module attributes {stable_mosaic.version = 11 : i64} {
  func.func @gat_fused_kernel(%arg0: memref<16x128xbf16, #tpu.memory_space<vmem>>, %arg1: memref<128x256xbf16, #tpu.memory_space<vmem>>, %arg2: memref<1x128xf32, #tpu.memory_space<vmem>>, %arg3: memref<128x256xbf16, #tpu.memory_space<vmem>>, %arg4: memref<1x128xf32, #tpu.memory_space<vmem>>, %arg5: memref<16x16xbf16, #tpu.memory_space<vmem>>, %arg6: memref<16x128xf32, #tpu.memory_space<vmem>>, %arg7: memref<16x128xf32, #tpu.memory_space<vmem>>) attributes {dimension_semantics = [], scalar_prefetch = 0 : i64, scratch_operands = 0 : i64, tpu.core_type = #tpu.core_type<tc>} {
    %c0 = arith.constant 0 : index
    %c0_0 = arith.constant 0 : index
    %0 = vector.load %arg5[%c0, %c0_0] : memref<16x16xbf16, #tpu.memory_space<vmem>>, vector<16x16xbf16>
    %1 = arith.extf %0 : vector<16x16xbf16> to vector<16x16xf32>
    %cst = arith.constant 1.000000e+00 : f32
    %2 = vector.broadcast %cst : f32 to vector<16x16xf32>
    %3 = arith.subf %1, %2 : vector<16x16xf32>
    %cst_1 = arith.constant 1.000000e+30 : f32
    %4 = vector.broadcast %cst_1 : f32 to vector<16x16xf32>
    %5 = arith.mulf %3, %4 : vector<16x16xf32>
    %c0_2 = arith.constant 0 : index
    %c0_3 = arith.constant 0 : index
    %6 = vector.load %arg0[%c0_2, %c0_3] : memref<16x128xbf16, #tpu.memory_space<vmem>>, vector<16x128xbf16>
    %c0_4 = arith.constant 0 : index
    %c0_5 = arith.constant 0 : index
    %7 = vector.load %arg1[%c0_4, %c0_5] : memref<128x256xbf16, #tpu.memory_space<vmem>>, vector<128x256xbf16>
    %cst_6 = arith.constant dense<0.000000e+00> : vector<16x256xf32>
    %8 = tpu.matmul %6, %7, %cst_6 {dimension_numbers = #tpu.dot_dimension_numbers<[1], [0], [0], [1], [0, 0, 1, 1], [], []>} : vector<16x128xbf16>, vector<128x256xbf16>, vector<16x256xf32> -> vector<16x256xf32>
    %9 = vector.extract_strided_slice %8 {offsets = [0, 0], sizes = [16, 128], strides = [1, 1]} : vector<16x256xf32> to vector<16x128xf32>
    %10 = arith.truncf %9 : vector<16x128xf32> to vector<16x128xbf16>
    %11 = vector.extract_strided_slice %8 {offsets = [0, 128], sizes = [16, 1], strides = [1, 1]} : vector<16x256xf32> to vector<16x1xf32>
    %12 = vector.extract_strided_slice %8 {offsets = [0, 129], sizes = [16, 1], strides = [1, 1]} : vector<16x256xf32> to vector<16x1xf32>
    %13 = tpu.transpose %11, [1, 0] : vector<16x1xf32> -> vector<1x16xf32>
    %14 = vector.broadcast %12 : vector<16x1xf32> to vector<16x16xf32>
    %15 = vector.broadcast %13 : vector<1x16xf32> to vector<16x16xf32>
    %16 = arith.addf %14, %15 : vector<16x16xf32>
    %cst_7 = arith.constant 0.000000e+00 : f32
    %17 = vector.broadcast %cst_7 : f32 to vector<16x16xf32>
    %18 = arith.cmpf ogt, %16, %17 : vector<16x16xf32>
    %cst_8 = arith.constant 2.000000e-01 : f32
    %19 = vector.broadcast %cst_8 : f32 to vector<16x16xf32>
    %20 = arith.mulf %19, %16 : vector<16x16xf32>
    %21 = arith.select %18, %16, %20 : vector<16x16xi1>, vector<16x16xf32>
    %22 = arith.addf %21, %5 : vector<16x16xf32>
    %cst_9 = arith.constant dense<0xFF800000> : vector<16xf32>
    %23 = vector.multi_reduction <maximumf>, %22, %cst_9 [1] : vector<16x16xf32> to vector<16xf32>
    %24 = vector.shape_cast %23 : vector<16xf32> to vector<16x1xf32>
    %25 = vector.broadcast %24 : vector<16x1xf32> to vector<16x16xf32>
    %26 = arith.subf %21, %25 : vector<16x16xf32>
    %27 = math.exp %26 : vector<16x16xf32>
    %28 = arith.mulf %1, %27 : vector<16x16xf32>
    %cst_10 = arith.constant dense<0.000000e+00> : vector<16xf32>
    %29 = vector.multi_reduction <add>, %28, %cst_10 [1] : vector<16x16xf32> to vector<16xf32>
    %30 = vector.shape_cast %29 : vector<16xf32> to vector<16x1xf32>
    %31 = tpu.reciprocal %30 {approx = true} : vector<16x1xf32> -> vector<16x1xf32>
    %32 = vector.broadcast %31 : vector<16x1xf32> to vector<16x16xf32>
    %33 = arith.mulf %28, %32 : vector<16x16xf32>
    %34 = arith.truncf %33 : vector<16x16xf32> to vector<16x16xbf16>
    %cst_11 = arith.constant dense<0.000000e+00> : vector<16x128xf32>
    %35 = tpu.matmul %34, %10, %cst_11 {dimension_numbers = #tpu.dot_dimension_numbers<[1], [0], [0], [1], [0, 0, 1, 1], [], []>} : vector<16x16xbf16>, vector<16x128xbf16>, vector<16x128xf32> -> vector<16x128xf32>
    %c0_12 = arith.constant 0 : index
    %c0_13 = arith.constant 0 : index
    %36 = vector.load %arg2[%c0_12, %c0_13] : memref<1x128xf32, #tpu.memory_space<vmem>>, vector<1x128xf32>
    %37 = vector.broadcast %36 : vector<1x128xf32> to vector<16x128xf32>
    %38 = arith.addf %35, %37 : vector<16x128xf32>
    %cst_14 = arith.constant 0.000000e+00 : f32
    %39 = vector.broadcast %cst_14 : f32 to vector<16x128xf32>
    %40 = arith.cmpf ogt, %38, %39 : vector<16x128xf32>
    %cst_15 = arith.constant 0.000000e+00 : f32
    %41 = vector.broadcast %cst_15 : f32 to vector<16x128xf32>
    %42 = arith.minimumf %38, %41 : vector<16x128xf32>
    %43 = math.exp %42 : vector<16x128xf32>
    %cst_16 = arith.constant 1.000000e+00 : f32
    %44 = vector.broadcast %cst_16 : f32 to vector<16x128xf32>
    %45 = arith.subf %43, %44 : vector<16x128xf32>
    %46 = arith.select %40, %38, %45 : vector<16x128xi1>, vector<16x128xf32>
    %c0_17 = arith.constant 0 : index
    %c0_18 = arith.constant 0 : index
    %47 = vector.load %arg7[%c0_17, %c0_18] : memref<16x128xf32, #tpu.memory_space<vmem>>, vector<16x128xf32>
    tpu.vector_store %arg7[%c0_17, %c0_18], %46 {strides = array<i32>} : memref<16x128xf32, #tpu.memory_space<vmem>>, vector<16x128xf32>,
    %48 = arith.truncf %46 : vector<16x128xf32> to vector<16x128xbf16>
    %c0_19 = arith.constant 0 : index
    %c0_20 = arith.constant 0 : index
    %49 = vector.load %arg3[%c0_19, %c0_20] : memref<128x256xbf16, #tpu.memory_space<vmem>>, vector<128x256xbf16>
    %cst_21 = arith.constant dense<0.000000e+00> : vector<16x256xf32>
    %50 = tpu.matmul %48, %49, %cst_21 {dimension_numbers = #tpu.dot_dimension_numbers<[1], [0], [0], [1], [0, 0, 1, 1], [], []>} : vector<16x128xbf16>, vector<128x256xbf16>, vector<16x256xf32> -> vector<16x256xf32>
    %51 = vector.extract_strided_slice %50 {offsets = [0, 0], sizes = [16, 128], strides = [1, 1]} : vector<16x256xf32> to vector<16x128xf32>
    %52 = arith.truncf %51 : vector<16x128xf32> to vector<16x128xbf16>
    %53 = vector.extract_strided_slice %50 {offsets = [0, 128], sizes = [16, 1], strides = [1, 1]} : vector<16x256xf32> to vector<16x1xf32>
    %54 = vector.extract_strided_slice %50 {offsets = [0, 129], sizes = [16, 1], strides = [1, 1]} : vector<16x256xf32> to vector<16x1xf32>
    %55 = tpu.transpose %53, [1, 0] : vector<16x1xf32> -> vector<1x16xf32>
    %56 = vector.broadcast %54 : vector<16x1xf32> to vector<16x16xf32>
    %57 = vector.broadcast %55 : vector<1x16xf32> to vector<16x16xf32>
    %58 = arith.addf %56, %57 : vector<16x16xf32>
    %cst_22 = arith.constant 0.000000e+00 : f32
    %59 = vector.broadcast %cst_22 : f32 to vector<16x16xf32>
    %60 = arith.cmpf ogt, %58, %59 : vector<16x16xf32>
    %cst_23 = arith.constant 2.000000e-01 : f32
    %61 = vector.broadcast %cst_23 : f32 to vector<16x16xf32>
    %62 = arith.mulf %61, %58 : vector<16x16xf32>
    %63 = arith.select %60, %58, %62 : vector<16x16xi1>, vector<16x16xf32>
    %64 = arith.addf %63, %5 : vector<16x16xf32>
    %cst_24 = arith.constant dense<0xFF800000> : vector<16xf32>
    %65 = vector.multi_reduction <maximumf>, %64, %cst_24 [1] : vector<16x16xf32> to vector<16xf32>
    %66 = vector.shape_cast %65 : vector<16xf32> to vector<16x1xf32>
    %67 = vector.broadcast %66 : vector<16x1xf32> to vector<16x16xf32>
    %68 = arith.subf %63, %67 : vector<16x16xf32>
    %69 = math.exp %68 : vector<16x16xf32>
    %70 = arith.mulf %1, %69 : vector<16x16xf32>
    %cst_25 = arith.constant dense<0.000000e+00> : vector<16xf32>
    %71 = vector.multi_reduction <add>, %70, %cst_25 [1] : vector<16x16xf32> to vector<16xf32>
    %72 = vector.shape_cast %71 : vector<16xf32> to vector<16x1xf32>
    %73 = tpu.reciprocal %72 {approx = true} : vector<16x1xf32> -> vector<16x1xf32>
    %74 = vector.broadcast %73 : vector<16x1xf32> to vector<16x16xf32>
    %75 = arith.mulf %70, %74 : vector<16x16xf32>
    %76 = arith.truncf %75 : vector<16x16xf32> to vector<16x16xbf16>
    %cst_26 = arith.constant dense<0.000000e+00> : vector<16x128xf32>
    %77 = tpu.matmul %76, %52, %cst_26 {dimension_numbers = #tpu.dot_dimension_numbers<[1], [0], [0], [1], [0, 0, 1, 1], [], []>} : vector<16x16xbf16>, vector<16x128xbf16>, vector<16x128xf32> -> vector<16x128xf32>
    %c0_27 = arith.constant 0 : index
    %c0_28 = arith.constant 0 : index
    %78 = vector.load %arg4[%c0_27, %c0_28] : memref<1x128xf32, #tpu.memory_space<vmem>>, vector<1x128xf32>
    %79 = vector.broadcast %78 : vector<1x128xf32> to vector<16x128xf32>
    %80 = arith.addf %77, %79 : vector<16x128xf32>
    %cst_29 = arith.constant 0.000000e+00 : f32
    %81 = vector.broadcast %cst_29 : f32 to vector<16x128xf32>
    %82 = arith.cmpf ogt, %80, %81 : vector<16x128xf32>
    %cst_30 = arith.constant 0.000000e+00 : f32
    %83 = vector.broadcast %cst_30 : f32 to vector<16x128xf32>
    %84 = arith.minimumf %80, %83 : vector<16x128xf32>
    %85 = math.exp %84 : vector<16x128xf32>
    %cst_31 = arith.constant 1.000000e+00 : f32
    %86 = vector.broadcast %cst_31 : f32 to vector<16x128xf32>
    %87 = arith.subf %85, %86 : vector<16x128xf32>
    %88 = arith.select %82, %80, %87 : vector<16x128xi1>, vector<16x128xf32>
    %c0_32 = arith.constant 0 : index
    %c0_33 = arith.constant 0 : index
    %89 = vector.load %arg6[%c0_32, %c0_33] : memref<16x128xf32, #tpu.memory_space<vmem>>, vector<16x128xf32>
    tpu.vector_store %arg6[%c0_32, %c0_33], %88 {strides = array<i32>} : memref<16x128xf32, #tpu.memory_space<vmem>>, vector<16x128xf32>,
    return
  }
}

</mosaic_0001>

<bundles_post_ra>
// kernel: _lambda_.1
= control target key start
LH: loop header
LB: loop body
LE: loop exit
PB: predicated region body
PF: predicated region fallthrough
CT: control target
= control target key end

     0   :  { %13 = vsyncpa [#allocation3], 0  ;;  %v844_v2 = vmov 0   ;;  %s1067_s0 = inlined_call_operand.vmem [shape: bf16[16,128], index: 0, kind: input, shape index: {}]   ;;  %s1068_s1 = inlined_call_operand.vmem [shape: bf16[128,256], index: 1, kind: input, shape index: {}]   ;;  %s1069_s2 = inlined_call_operand.vmem [shape: f32[1,128], index: 2, kind: input, shape index: {}, may-alias: {2,4}]   ;;  %s1070_s3 = inlined_call_operand.vmem [shape: bf16[128,256], index: 3, kind: input, shape index: {}]   ;;  %s1071_s4 = inlined_call_operand.vmem [shape: f32[1,128], index: 4, kind: input, shape index: {}, may-alias: {2,4}]   ;;  %s1072_s5 = inlined_call_operand.vmem [shape: bf16[16,16], index: 5, kind: input, shape index: {}]   ;;  %s1073_s6 = inlined_call_operand.hbm [shape: f32[16,128], index: 6, kind: output, shape index: {0}]   ;;  %s1074_s7 = inlined_call_operand.hbm [shape: f32[16,128], index: 7, kind: output, shape index: {1}]  }
   0x1   :  { %v723_v0 = vld [vmem:[%s1068_s1 + $0x4] ss:$8 sps:$4 sm:$0xff]   ;;  %v725_v1 = vld [vmem:[%s1068_s1] ss:$8 sps:$4 sm:$0xff]   ;;  %172 = vmatprep.mubr.bf16.mxu0 %v844_v2  ;;  %v726_v3 = vld [vmem:[%s1068_s1 + $0x14] ss:$8 sps:$4 sm:$0xff]  }
   0x2   :  { %140 = vmatprep.subr.bf16.mxu0 %v723_v0  ;;  %v728_v4 = vld [vmem:[%s1068_s1 + $0x10] ss:$8 sps:$4 sm:$0xff]   ;;  %v729_v5 = vld [vmem:[%s1068_s1 + $0x24] ss:$8 sps:$4 sm:$0xff]   ;;  %v731_v6 = vld [vmem:[%s1068_s1 + $0x20] ss:$8 sps:$4 sm:$0xff]  }
   0x3   :  { %141 = vmatpush1.bf16.msra.mxu0 %v725_v1  ;;  %v732_v7 = vld [vmem:[%s1068_s1 + $0x34] ss:$8 sps:$4 sm:$0xff]   ;;  %v734_v8 = vld [vmem:[%s1068_s1 + $0x30] ss:$8 sps:$4 sm:$0xff]   ;;  %v735_v9 = vld [vmem:[%s1068_s1 + $0x44] ss:$8 sps:$4 sm:$0xff]  }
   0x4   :  { %142 = vmatprep.subr.bf16.mxu0 %v726_v3  ;;  %v737_v10 = vld [vmem:[%s1068_s1 + $0x40] ss:$8 sps:$4 sm:$0xff]   ;;  %v738_v11 = vld [vmem:[%s1068_s1 + $0x54] ss:$8 sps:$4 sm:$0xff]  }
   0x7   :  { %143 = vmatpush1.bf16.msra.mxu0 %v728_v4 }
   0x8   :  { %144 = vmatprep.subr.bf16.mxu0 %v729_v5 }
   0xb   :  { %145 = vmatpush1.bf16.msra.mxu0 %v731_v6 }
   0xc   :  { %146 = vmatprep.subr.bf16.mxu0 %v732_v7 }
   0xf   :  { %147 = vmatpush1.bf16.msra.mxu0 %v734_v8 }
  0x10   :  { %148 = vmatprep.subr.bf16.mxu0 %v735_v9 }
  0x11   :  { %14 = vsyncpa [#allocation5], 0  ;;  %v740_v12 = vld [vmem:[%s1068_s1 + $0x50] ss:$8 sps:$4 sm:$0xff]   ;;  %v741_v13 = vld [vmem:[%s1068_s1 + $0x64] ss:$8 sps:$4 sm:$0xff]   ;;  %v226_v25 = vlaneseq }
  0x12   :  { %v743_v14 = vld [vmem:[%s1068_s1 + $0x60] ss:$8 sps:$4 sm:$0xff]   ;;  %v744_v15 = vld [vmem:[%s1068_s1 + $0x74] ss:$8 sps:$4 sm:$0xff]   ;;  %v746_v16 = vld [vmem:[%s1068_s1 + $0x70] ss:$8 sps:$4 sm:$0xff]  }
  0x13   :  { %149 = vmatpush1.bf16.msra.mxu0 %v737_v10  ;;  %v747_v17 = vld [vmem:[%s1067_s0] sm:$0xff]   ;;  %v845_v18 = vmov 1   ;;  %v846_v19 = vmov 0.0   ;;  %v944_v26 = vshrl.u32 %v226_v25, 7  ;;  %vm240_vm2 = vcmask 130048  }
  0x14   :  { %150 = vmatprep.subr.bf16.mxu0 %v738_v11  ;;  %721 = vset.pattern.permute.xlu0 %v845_v18  ;;  %v694_v27 = vld [vmem:[%s1072_s5] sm:$0xff]   ;;  %vm847_vm3 = vmmov 0   ;;  %v753_v7 = vld [vmem:[%s1070_s3 + $0x14] ss:$8 sps:$4 sm:$0xff]   ;;  %v751_v8 = vld [vmem:[%s1070_s3 + $0x10] ss:$8 sps:$4 sm:$0xff]  }
  0x15   :  { %701 = vmatprep.subr.bf16.mxu1 %v846_v19  ;;  %v949_v28 = vunpack.c.l.bf16 %v694_v27  ;;  %v228_v29 = vsub.s32 0, %v944_v26  ;;  %v952_v30 = vunpack.c.h.bf16 %v694_v27  ;;  %703 = vmatprep.mubr.msk.bf16.mxu1 %vm847_vm3, %v846_v19  ;;  %v750_v61 = vld [vmem:[%s1070_s3 + $0x4] ss:$8 sps:$4 sm:$0xff]   ;;  %v748_v5 = vld [vmem:[%s1070_s3] ss:$8 sps:$4 sm:$0xff]  }
  0x16   :  { %v756_v9 = vld [vmem:[%s1070_s3 + $0x24] ss:$8 sps:$4 sm:$0xff]   ;;  %v754_v10 = vld [vmem:[%s1070_s3 + $0x20] ss:$8 sps:$4 sm:$0xff]   ;;  %v759_v11 = vld [vmem:[%s1070_s3 + $0x34] ss:$8 sps:$4 sm:$0xff]  }
  0x17   :  { %151 = vmatpush1.bf16.msra.mxu0 %v740_v12  ;;  %v650_v33 = vadd.f32 -1.0, %v949_v28  ;;  %v651_v35 = vadd.f32 -1.0, %v952_v30  ;;  %v762_v12 = vld [vmem:[%s1070_s3 + $0x44] ss:$8 sps:$4 sm:$0xff]  }
  0x18   :  { %152 = vmatprep.subr.bf16.mxu0 %v741_v13  ;;  %v760_v13 = vld [vmem:[%s1070_s3 + $0x40] ss:$8 sps:$4 sm:$0xff]  }
  0x19   :  { %v958_v39 = vmul.f32 1e+30, %v650_v33  ;;  %v960_v41 = vmul.f32 1e+30, %v651_v35 }
  0x1b   :  { %153 = vmatpush1.bf16.msra.mxu0 %v743_v14  ;;  %v765_v14 = vld [vmem:[%s1070_s3 + $0x54] ss:$8 sps:$4 sm:$0xff]  }
  0x1c   :  { %154 = vmatprep.subr.bf16.mxu0 %v744_v15  ;;  %v763_v15 = vld [vmem:[%s1070_s3 + $0x50] ss:$8 sps:$4 sm:$0xff]  }
  0x1f   :  { %155 = vmatpush1.bf16.msra.mxu0 %v746_v16  ;;  %v768_v16 = vld [vmem:[%s1070_s3 + $0x64] ss:$8 sps:$4 sm:$0xff]  }
  0x20   :  { %707 = vmatprep.subr.bf16.mxu0 %v846_v19 }
  0x22   :  { %173 = vmatmul.mubr.bf16.vlgmr.msra.gmra.mrb[0].mxu0 %v747_v17  ;;  %v766_v17 = vld [vmem:[%s1070_s3 + $0x60] ss:$8 sps:$4 sm:$0xff]  }
  0x23   :  { %709 = vmatprep.mubr.msk.bf16.mxu0 %vm847_vm3, %v846_v19  ;;  %v769_v19 = vld [vmem:[%s1070_s3 + $0x70] ss:$8 sps:$4 sm:$0xff]  }
  0xf5   :  { %v174_v20 = vpop.f32.mrb[0].mxu0 }
  0xf6   :  { %v176_v21 = vpop.f32.mrb[1].mxu0 }
  0xf7   :  { %184 = vxpose.xlu1.b32.start [1/2] (short) (narrow) %v176_v21, 8  ;;  %218 = vperm.xlu0 %721, %v176_v21   ;;  %v178_v22 = vpop.f32.mrb[2].mxu0 }
  0xf8   :  { %v183_v23 = vpack.c.bf16 %v178_v22, %v174_v20  ;;  %v180_v24 = vpop.f32.mrb[3].mxu0  ;;  %v669_v20 = vld [vmem:[%s1069_s2] ss:$0 sm:$0xff]  ;;  %s848_s2 = smov [#allocation4]  }
  0xfa   :  { %702 = vmatpush3.bf16.msra.mxu1 %v183_v23 }
  0xfb   :  { %185 = vxpose.xlu1.b32.end [2/2] (short) (narrow) %v180_v24, 8  ;;  %223 = vperm.xlu0 %721, %v180_v24  }
  0xfc   :  { %428 = vmatprep.subr.bf16.mxu1 %v750_v61 }
 0x119   :  { %722 = vset.pattern.permute.xlu1 %v845_v18  ;;  %v771_v18 = vld [vmem:[%s1070_s3 + $0x74] ss:$8 sps:$4 sm:$0xff]  }
 0x176   :  { %v219_v31 = vpop.permute.xlu0 %218 }
 0x177   :  { %v200_v32 = vpop.trf.xlu1 }
 0x178   :  { %v229_v34 = vrot.slane %v200_v32, %v228_v29 }
 0x17a   :  { %v230_v36 = vadd.f32 %v229_v34, %v219_v31  ;;  %v224_v37 = vpop.permute.xlu0 %223 }
 0x17b   :  { %v231_v38 = vadd.f32 %v229_v34, %v224_v37 }
 0x17c   :  { %v234_v40 = vmul.f32 0.2, %v230_v36  ;;  %vm232_vm0 = vcmp.gt.f32.partialorder %v230_v36, 0.0 }
 0x17d   :  { %vm233_vm1 = vcmp.gt.f32.partialorder %v231_v38, 0.0  ;;  %v235_v42 = vmul.f32 0.2, %v231_v38 }
 0x17e   :  { %v236_v43 = vsel %vm232_vm0, %v230_v36, %v234_v40 }
 0x17f   :  { %v238_v44 = vadd.f32 %v236_v43, %v958_v39  ;;  %v237_v45 = vsel %vm233_vm1, %v231_v38, %v235_v42 }
 0x180   :  { %v239_v46 = vadd.f32 %v237_v45, %v960_v41 }
 0x181   :  { %v241_v47 = vsel %vm240_vm2, %v238_v44, -inf }
 0x182   :  { %242 = vmax.xlane.f32.xlu0 %v241_v47  ;;  %v244_v48 = vsel %vm240_vm2, %v239_v46, -inf }
 0x183   :  { %245 = vmax.xlane.f32.xlu1 %v244_v48 }
 0x20f   :  { %v243_v49 = vpop.xlane.xlu0 %242 }
 0x210   :  { %v247_v50 = vsub.f32 %v236_v43, %v243_v49  ;;  %v246_v51 = vpop.xlane.xlu1 %245 }
 0x211   :  { %v248_v52 = vsub.f32 %v237_v45, %v246_v51 }
 0x212   :  { %v249_v53 = vmul.f32 1.442695, %v247_v50 }
 0x213   :  { %v251_v54 = vmul.f32 1.442695, %v248_v52 }
 0x214   :  { %772 = vpow2.f32 %v249_v53 }
 0x215   :  { %774 = vpow2.f32 %v251_v54 }
 0x21e   :  { %v773_v55 = vpop.eup %772 }
 0x21f   :  { %v775_v56 = vpop.eup %774  ;;  %v253_v57 = vmul.f32 %v773_v55, %v949_v28 }
 0x220   :  { %v254_v59 = vmul.f32 %v775_v56, %v952_v30 }
 0x221   :  { %v255_v58 = vsel %vm240_vm2, %v253_v57, 0.0 }
 0x222   :  { %256 = vadd.xlane.f32.xlu0 %v255_v58  ;;  %v258_v60 = vsel %vm240_vm2, %v254_v59, 0.0 }
 0x226   :  { %259 = vadd.xlane.f32.xlu0 %v258_v60 }
 0x2af   :  { %v257_v62 = vpop.xlane.xlu0 %256 }
 0x2b0   :  { %776 = vrcp.f32 %v257_v62 }
 0x2b3   :  { %v260_v63 = vpop.xlane.xlu0 %259 }
 0x2b4   :  { %778 = vrcp.f32 %v260_v63 }
 0x2ba   :  { %v777_v0 = vpop.eup %776 }
 0x2bb   :  { %v263_v3 = vmul.f32 %v777_v0, %v253_v57 }
 0x2be   :  { %v779_v1 = vpop.eup %778 }
 0x2bf   :  { %v264_v4 = vmul.f32 %v779_v1, %v254_v59 }
 0x2c1   :  { %v265_v6 = vpack.c.bf16 %v264_v4, %v263_v3 }
 0x2c3   :  { %704 = vmatmul.mubr.msk.bf16.vlgmr.msra.gmra.mrb[0].mxu1 %vm240_vm2, %v265_v6 }
 0x2c4   :  { %429 = vmatpush1.bf16.msra.mxu1 %v748_v5  ;;  %460 = vmatprep.mubr.bf16.mxu1 %v844_v2  ;;  %v757_v2 = vld [vmem:[%s1070_s3 + $0x30] ss:$8 sps:$4 sm:$0xff]   ;;  %s635_s3 = sshll.u32 %s848_s2, 4  ;;  %s636_s3 = int_to_ptr.vmem [resolvable:$true] %s635_s3 }
 0x2c5   :  { %430 = vmatprep.subr.bf16.mxu1 %v753_v7  ;;  %s796_s19 = scalar_lea.vmem %s636_s3, 256  ;;  %p801_p1 = scmp.lt.s32.totalorder %s636_s3, %s636_s3 }
 0x2c6   :  { %p797_p0 = scmp.ne.s32.totalorder %s636_s3, %s796_s19  ;;  %p802_p2 = scmp.lt.s32.totalorder %s796_s19, %s796_s19 }
 0x2c8   :  { %431 = vmatpush1.bf16.msra.mxu1 %v751_v8  ;;  %p803_p3 = por %p802_p2, %p801_p1 }
 0x2c9   :  { %432 = vmatprep.subr.bf16.mxu1 %v756_v9 }
 0x2ca   :  { %p804_p4 = pnand %p803_p3, %p797_p0 }
 0x2cc   :  { %433 = vmatpush1.bf16.msra.mxu1 %v754_v10 }
 0x2cd   :  { %434 = vmatprep.subr.bf16.mxu1 %v759_v11 }
 0x2d0   :  { %435 = vmatpush1.bf16.msra.mxu1 %v757_v2 }
 0x2d1   :  { %436 = vmatprep.subr.bf16.mxu1 %v762_v12 }
 0x2d4   :  { %437 = vmatpush1.bf16.msra.mxu1 %v760_v13 }
 0x2d5   :  { %438 = vmatprep.subr.bf16.mxu1 %v765_v14 }
 0x2d8   :  { %439 = vmatpush1.bf16.msra.mxu1 %v763_v15 }
 0x2d9   :  { %440 = vmatprep.subr.bf16.mxu1 %v768_v16 }
 0x2dc   :  { %441 = vmatpush1.bf16.msra.mxu1 %v766_v17 }
 0x2dd   :  { %442 = vmatprep.subr.bf16.mxu1 %v771_v18 }
 0x2e0   :  { %443 = vmatpush1.bf16.msra.mxu1 %v769_v19 }
 0x396   :  { %v310_v21 = vpop.f32.mrb[0].mxu1 }
 0x397   :  { %v311_v22 = vadd.f32 %v669_v20, %v310_v21  ;;  %v705_v23 = vpop.f32.mrb[1].mxu1 }
 0x398   :  { %v313_v24 = vpop.f32.mrb[2].mxu1 }
 0x399   :  { %v319_v25 = vmin.f32 %v311_v22, 0.0  ;;  %v314_v27 = vadd.f32 %v669_v20, %v313_v24  ;;  %v706_v31 = vpop.f32.mrb[3].mxu1  ;;  %vm317_vm4 = vcmp.gt.f32.partialorder %v311_v22, 0.0 }
 0x39b   :  { %v321_v32 = vmul.f32 1.442695, %v319_v25  ;;  %v320_v33 = vmin.f32 %v314_v27, 0.0  ;;  %vm318_vm5 = vcmp.gt.f32.partialorder %v314_v27, 0.0 }
 0x39d   :  { %780 = vpow2.f32 %v321_v32  ;;  %v323_v34 = vmul.f32 1.442695, %v320_v33 }
 0x39f   :  { %782 = vpow2.f32 %v323_v34 }
 0x3a7   :  { %v781_v35 = vpop.eup %780 }
 0x3a8   :  { %v671_v36 = vadd.f32 -1.0, %v781_v35 }
 0x3a9   :  { %v783_v37 = vpop.eup %782 }
 0x3aa   :  { %v327_v38 = vsel %vm317_vm4, %v311_v22, %v671_v36  ;;  %v672_v40 = vadd.f32 -1.0, %v783_v37 }
 0x3ab   :  { %329 = vst [vmem:[#allocation4] sm:$0xff] %v327_v38 }
 0x3ac   :  { %v328_v42 = vsel %vm318_vm5, %v314_v27, %v672_v40 }
 0x3ad   :  { %330 = vst [vmem:[#allocation4 + $0x8] sm:$0xff] %v328_v42  ;;  %v331_v43 = vpack.c.bf16 %v328_v42, %v327_v38 }
 0x3af   :  { %461 = vmatmul.mubr.bf16.vlgmr.msra.gmra.mrb[4].mxu1 %v331_v43 }
 0x482   :  { %v462_v44 = vpop.f32.mrb[4].mxu1 }
 0x483   :  { %v464_v45 = vpop.f32.mrb[5].mxu1 }
 0x484   :  { %506 = vperm.xlu0 %721, %v464_v45   ;;  %v466_v46 = vpop.f32.mrb[6].mxu1 }
 0x485   :  { %v471_v47 = vpack.c.bf16 %v466_v46, %v462_v44  ;;  %v468_v48 = vpop.f32.mrb[7].mxu1 }
 0x486   :  { %511 = vperm.xlu1 %722, %v468_v48  }
 0x487   :  { %708 = vmatpush3.bf16.msra.mxu0 %v471_v47 }
 0x4af   :  { %472 = vxpose.xlu1.b32.start [1/2] (short) (narrow) %v464_v45, 8 }
 0x4b3   :  { %473 = vxpose.xlu1.b32.end [2/2] (short) (narrow) %v468_v48, 8 }
 0x503   :  { %v507_v52 = vpop.permute.xlu0 %506 }
 0x505   :  { %v512_v49 = vpop.permute.xlu1 %511 }
 0x52f   :  { %v488_v50 = vpop.trf.xlu1 }
 0x530   :  { %v517_v51 = vrot.slane %v488_v50, %v228_v29 }
 0x532   :  { %v518_v53 = vadd.f32 %v517_v51, %v507_v52  ;;  %v519_v54 = vadd.f32 %v517_v51, %v512_v49 }
 0x534   :  { %v522_v55 = vmul.f32 0.2, %v518_v53  ;;  %v523_v56 = vmul.f32 0.2, %v519_v54  ;;  %vm520_vm6 = vcmp.gt.f32.partialorder %v518_v53, 0.0  ;;  %vm521_vm7 = vcmp.gt.f32.partialorder %v519_v54, 0.0 }
 0x536   :  { %v524_v57 = vsel %vm520_vm6, %v518_v53, %v522_v55  ;;  %v525_v58 = vsel %vm521_vm7, %v519_v54, %v523_v56 }
 0x537   :  { %v526_v59 = vadd.f32 %v524_v57, %v958_v39  ;;  %v527_v61 = vadd.f32 %v525_v58, %v960_v41 }
 0x539   :  { %v528_v60 = vsel %vm240_vm2, %v526_v59, -inf  ;;  %v531_v62 = vsel %vm240_vm2, %v527_v61, -inf }
 0x53a   :  { %529 = vmax.xlane.f32.xlu0 %v528_v60 }
 0x53e   :  { %532 = vmax.xlane.f32.xlu0 %v531_v62 }
 0x5c7   :  { %v530_v26 = vpop.xlane.xlu0 %529 }
 0x5c8   :  { %v534_v29 = vsub.f32 %v524_v57, %v530_v26 }
 0x5ca   :  { %v536_v63 = vmul.f32 1.442695, %v534_v29 }
 0x5cb   :  { %v533_v0 = vpop.xlane.xlu0 %532 }
 0x5cc   :  { %784 = vpow2.f32 %v536_v63  ;;  %v535_v1 = vsub.f32 %v525_v58, %v533_v0 }
 0x5ce   :  { %v538_v3 = vmul.f32 1.442695, %v535_v1 }
 0x5d0   :  { %786 = vpow2.f32 %v538_v3 }
 0x5d6   :  { %v785_v4 = vpop.eup %784 }
 0x5d7   :  { %v540_v5 = vmul.f32 %v785_v4, %v949_v28 }
 0x5d9   :  { %v542_v39 = vsel %vm240_vm2, %v540_v5, 0.0 }
 0x5da   :  { %v787_v6 = vpop.eup %786  ;;  %543 = vadd.xlane.f32.xlu0 %v542_v39 }
 0x5db   :  { %v541_v41 = vmul.f32 %v787_v6, %v952_v30 }
 0x5dd   :  { %v545_v7 = vsel %vm240_vm2, %v541_v41, 0.0 }
 0x5de   :  { %546 = vadd.xlane.f32.xlu0 %v545_v7 }
 0x667   :  { %v544_v8 = vpop.xlane.xlu0 %543 }
 0x668   :  { %788 = vrcp.f32 %v544_v8 }
 0x66b   :  { %v547_v9 = vpop.xlane.xlu0 %546 }
 0x66c   :  { %790 = vrcp.f32 %v547_v9 }
 0x672   :  { %v789_v10 = vpop.eup %788 }
 0x673   :  { %v550_v2 = vmul.f32 %v789_v10, %v540_v5 }
 0x676   :  { %v791_v11 = vpop.eup %790 }
 0x677   :  { %v551_v12 = vmul.f32 %v791_v11, %v541_v41 }
 0x679   :  { %v552_v13 = vpack.c.bf16 %v551_v12, %v550_v2 }
 0x67b   :  { %710 = vmatmul.mubr.msk.bf16.vlgmr.msra.gmra.mrb[4].mxu0 %vm240_vm2, %v552_v13 }
 0x67c   :  { %807 = shalt.err (!%p804_p4)
}
 0x67d   :  { %s808_s22 = scalar_lea.hbm %s1074_s7, 256 }
 0x67e   :  { %p809_p5 = scmp.ne.s32.totalorder %s1074_s7, %s808_s22  ;;  %p812_p6 = scmp.lt.u32.totalorder %s808_s22, %s1074_s7 }
 0x680   :  { %p814_p7 = pnand %p812_p6, %p809_p5 }
 0x682   :  { %817 = shalt.err (!%p814_p7)
}
 0x683   :  { %s849_s27 = smov 128   ;;  %s850_s28 = smov 8   ;;  %v689_v28 = vld [vmem:[%s1071_s4] ss:$0 sm:$0xff] }
 0x684   :  { %641 = dma.vmem_to_hbm [thread:$0]  %s636_s3, 256, %s1074_s7, [#allocation5], %s849_s27, %s849_s27, %s850_s28  }
 0x685   :  { %s851_s10 = smov [#allocation2]  }
 0x686   :  { %s623_s7 = sshll.u32 %s851_s10, 4  ;;  %s624_s7 = int_to_ptr.vmem [resolvable:$true] %s623_s7 }
 0x687   :  { %s818_s4 = scalar_lea.vmem %s624_s7, 256  ;;  %p823_p9 = scmp.lt.s32.totalorder %s624_s7, %s624_s7 }
 0x688   :  { %p819_p8 = scmp.ne.s32.totalorder %s624_s7, %s818_s4  ;;  %p824_p10 = scmp.lt.s32.totalorder %s818_s4, %s818_s4 }
 0x68a   :  { %p825_p11 = por %p824_p10, %p823_p9 }
 0x68c   :  { %p826_p12 = pnand %p825_p11, %p819_p8 }
 0x74e   :  { %v597_v30 = vpop.f32.mrb[4].mxu0 }
 0x74f   :  { %v598_v14 = vadd.f32 %v689_v28, %v597_v30  ;;  %v711_v15 = vpop.f32.mrb[5].mxu0 }
 0x750   :  { %v600_v16 = vpop.f32.mrb[6].mxu0 }
 0x751   :  { %v606_v17 = vmin.f32 %v598_v14, 0.0  ;;  %v601_v18 = vadd.f32 %v689_v28, %v600_v16  ;;  %v712_v19 = vpop.f32.mrb[7].mxu0  ;;  %vm604_vm8 = vcmp.gt.f32.partialorder %v598_v14, 0.0 }
 0x753   :  { %v608_v20 = vmul.f32 1.442695, %v606_v17  ;;  %v607_v21 = vmin.f32 %v601_v18, 0.0  ;;  %vm605_vm9 = vcmp.gt.f32.partialorder %v601_v18, 0.0 }
 0x755   :  { %792 = vpow2.f32 %v608_v20  ;;  %v610_v22 = vmul.f32 1.442695, %v607_v21 }
 0x757   :  { %794 = vpow2.f32 %v610_v22 }
 0x75f   :  { %v793_v23 = vpop.eup %792 }
 0x760   :  { %v691_v24 = vadd.f32 -1.0, %v793_v23 }
 0x761   :  { %v795_v25 = vpop.eup %794 }
 0x762   :  { %v614_v27 = vsel %vm604_vm8, %v598_v14, %v691_v24  ;;  %v692_v31 = vadd.f32 -1.0, %v795_v25 }
 0x763   :  { %616 = vst [vmem:[#allocation2] sm:$0xff] %v614_v27 }
 0x764   :  { %v615_v32 = vsel %vm605_vm9, %v601_v18, %v692_v31 }
 0x765   :  { %617 = vst [vmem:[#allocation2 + $0x8] sm:$0xff] %v615_v32 }
 0x766   :  { %829 = shalt.err (!%p826_p12)
}
 0x767   :  { %s830_s1 = scalar_lea.hbm %s1073_s6, 256 }
 0x768   :  { %p831_p13 = scmp.ne.s32.totalorder %s1073_s6, %s830_s1  ;;  %p834_p0 = scmp.lt.u32.totalorder %s830_s1, %s1073_s6 }
 0x76a   :  { %p836_p1 = pnand %p834_p0, %p831_p13 }
 0x76c   :  { %839 = shalt.err (!%p836_p1)
}
 0x76d   :  { %629 = dma.vmem_to_hbm [thread:$0]  %s624_s7, 256, %s1073_s6, [#allocation3], %s849_s27, %s849_s27, %s850_s28  }
 0x76e   :  { %840 = dma.done.wait [#allocation3], 256  }
 0x76f   :  { %841 = vsyncadd [#allocation3], 4294967040 }
 0x770   :  { %842 = dma.done.wait [#allocation5], 256  }
 0x771   :  { %843 = vsyncadd [#allocation5], 4294967040 }
 0x772   :  { %648 = vsyncpa [#allocation3], 1 }
 0x773   :  { %649 = vsyncpa [#allocation5], 1 }

</bundles_post_ra>
